<compile_context>
chip_gen: v5e
topology: v5e:2x2
jax: 0.10.0
libtpu: 0.0.40
codegen_flags: <defaults>
</compile_context>

<pallas_src>
import functools

import numpy as np
import jax
import jax.numpy as jnp
from jax import lax
from jax.experimental import pallas as pl
from jax.experimental.pallas import tpu as pltpu

_NEG_INF = -1e30


# ----------------------------------------------------------------------------
# Helpers: tiling / padding
# ----------------------------------------------------------------------------
def _round_up(x, m):
    return ((x + m - 1) // m) * m


def _pick_tile(dim, max_tile, base):
    """Pick a tile size (multiple of `base`) dividing the base-padded dim."""
    d = _round_up(dim, base)
    t = min(max_tile, d)
    t = (t // base) * base
    while d % t != 0:
        t -= base
    return t, d


def _pad2d(a, r, c):
    R, C = a.shape
    if (R, C) == (r, c):
        return a
    return jnp.pad(a, ((0, r - R), (0, c - C)))


def _pad1d(v, n):
    if v.shape[0] == n:
        return v
    return jnp.pad(v, (0, n - v.shape[0]))


# ----------------------------------------------------------------------------
# RMSNorm (row-tiled)
# ----------------------------------------------------------------------------
def _rmsnorm_kernel(x_ref, w_ref, o_ref, *, eps):
    x = x_ref[...].astype(jnp.float32)
    var = jnp.mean(x * x, axis=-1, keepdims=True)
    o_ref[...] = (x * lax.rsqrt(var + eps) * w_ref[...]).astype(o_ref.dtype)


def rmsnorm(x, w, eps=1e-6, tm=256):
    M, D = x.shape
    tm, M_pad = _pick_tile(M, tm, 8)
    x_p = _pad2d(x, M_pad, D)
    out = pl.pallas_call(
        functools.partial(_rmsnorm_kernel, eps=eps),
        out_shape=jax.ShapeDtypeStruct((M_pad, D), x.dtype),
        grid=(M_pad // tm,),
        in_specs=[
            pl.BlockSpec((tm, D), lambda i: (i, 0)),
            pl.BlockSpec((1, D), lambda i: (0, 0)),
        ],
        out_specs=pl.BlockSpec((tm, D), lambda i: (i, 0)),
        compiler_params=pltpu.CompilerParams(dimension_semantics=("parallel",)),
    )(x_p, w.reshape(1, D))
    return out[:M]


# ----------------------------------------------------------------------------
# Tiled linear (x @ W + b, optional activation).  W stored (K, N) bf16.
# ----------------------------------------------------------------------------
def _linear_kernel(*refs, act, has_bias):
    if has_bias:
        x_ref, w_ref, b_ref, o_ref, acc_ref = refs
    else:
        x_ref, w_ref, o_ref, acc_ref = refs
        b_ref = None
    k = pl.program_id(2)

    @pl.when(k == 0)
    def _init():
        acc_ref[...] = jnp.zeros_like(acc_ref)

    acc_ref[...] += jnp.dot(x_ref[...].astype(jnp.bfloat16), w_ref[...],
                            preferred_element_type=jnp.float32)

    @pl.when(k == pl.num_programs(2) - 1)
    def _fin():
        y = acc_ref[...]
        if has_bias:
            y = y + b_ref[...].astype(jnp.float32)
        if act == "gelu":  # exact erf gelu (matches F.gelu default)
            y = 0.5 * y * (1.0 + lax.erf(y * 0.7071067811865476))
        elif act == "silu":
            y = y * jax.nn.sigmoid(y)
        o_ref[...] = y.astype(o_ref.dtype)


def linear(x, w, b=None, act="none", tm=256, tn=256, tk=512):
    """x: (M, K) f32; w: (K, N) bf16 (pre-transposed at load); b: (N,) f32 or None."""
    M, K = x.shape
    _, N = w.shape
    tm, M_pad = _pick_tile(M, tm, 16)
    tk, K_pad = _pick_tile(K, tk, 128)
    tn, N_pad = _pick_tile(N, tn, 128)
    x_p = _pad2d(x, M_pad, K_pad)
    w_p = _pad2d(w, K_pad, N_pad)
    has_bias = b is not None
    args = [x_p, w_p]
    in_specs = [
        pl.BlockSpec((tm, tk), lambda i, j, k: (i, k)),
        pl.BlockSpec((tk, tn), lambda i, j, k: (k, j)),
    ]
    if has_bias:
        args.append(_pad1d(b, N_pad).reshape(1, N_pad))
        in_specs.append(pl.BlockSpec((1, tn), lambda i, j, k: (0, j)))
    out = pl.pallas_call(
        functools.partial(_linear_kernel, act=act, has_bias=has_bias),
        out_shape=jax.ShapeDtypeStruct((M_pad, N_pad), jnp.float32),
        grid=(M_pad // tm, N_pad // tn, K_pad // tk),
        in_specs=in_specs,
        out_specs=pl.BlockSpec((tm, tn), lambda i, j, k: (i, j)),
        scratch_shapes=[pltpu.VMEM((tm, tn), jnp.float32)],
        compiler_params=pltpu.CompilerParams(
            dimension_semantics=("parallel", "parallel", "arbitrary")),
    )(*args)
    return out[:M, :N]


# ----------------------------------------------------------------------------
# Fused gate/up projection: silu(x@Wg + bg) * (x@Wu + bu), tiled.
# ----------------------------------------------------------------------------
def _gate_up_kernel(*refs, has_bias):
    if has_bias:
        x_ref, wg_ref, wu_ref, bg_ref, bu_ref, o_ref, accg, accu = refs
    else:
        x_ref, wg_ref, wu_ref, o_ref, accg, accu = refs
        bg_ref = bu_ref = None
    k = pl.program_id(2)

    @pl.when(k == 0)
    def _init():
        accg[...] = jnp.zeros_like(accg)
        accu[...] = jnp.zeros_like(accu)

    xb = x_ref[...].astype(jnp.bfloat16)
    accg[...] += jnp.dot(xb, wg_ref[...], preferred_element_type=jnp.float32)
    accu[...] += jnp.dot(xb, wu_ref[...], preferred_element_type=jnp.float32)

    @pl.when(k == pl.num_programs(2) - 1)
    def _fin():
        g = accg[...]
        u = accu[...]
        if has_bias:
            g = g + bg_ref[...].astype(jnp.float32)
            u = u + bu_ref[...].astype(jnp.float32)
        o_ref[...] = (g * jax.nn.sigmoid(g) * u).astype(o_ref.dtype)


def gate_up(x, wg, wu, bg=None, bu=None, tm=256, tn=256, tk=512):
    M, K = x.shape
    _, I = wg.shape
    tm, M_pad = _pick_tile(M, tm, 16)
    tk, K_pad = _pick_tile(K, tk, 128)
    tn, I_pad = _pick_tile(I, tn, 128)
    x_p = _pad2d(x, M_pad, K_pad)
    wg_p = _pad2d(wg, K_pad, I_pad)
    wu_p = _pad2d(wu, K_pad, I_pad)
    has_bias = bg is not None
    args = [x_p, wg_p, wu_p]
    in_specs = [
        pl.BlockSpec((tm, tk), lambda i, j, k: (i, k)),
        pl.BlockSpec((tk, tn), lambda i, j, k: (k, j)),
        pl.BlockSpec((tk, tn), lambda i, j, k: (k, j)),
    ]
    if has_bias:
        args += [_pad1d(bg, I_pad).reshape(1, I_pad),
                 _pad1d(bu, I_pad).reshape(1, I_pad)]
        in_specs += [pl.BlockSpec((1, tn), lambda i, j, k: (0, j)),
                     pl.BlockSpec((1, tn), lambda i, j, k: (0, j))]
    out = pl.pallas_call(
        functools.partial(_gate_up_kernel, has_bias=has_bias),
        out_shape=jax.ShapeDtypeStruct((M_pad, I_pad), jnp.float32),
        grid=(M_pad // tm, I_pad // tn, K_pad // tk),
        in_specs=in_specs,
        out_specs=pl.BlockSpec((tm, tn), lambda i, j, k: (i, j)),
        scratch_shapes=[pltpu.VMEM((tm, tn), jnp.float32),
                        pltpu.VMEM((tm, tn), jnp.float32)],
        compiler_params=pltpu.CompilerParams(
            dimension_semantics=("parallel", "parallel", "arbitrary")),
    )(*args)
    return out[:M, :I]


# ----------------------------------------------------------------------------
# Flash attention with fused RoPE, segment masks built in-kernel, GQA via index_map
# ----------------------------------------------------------------------------
def _rope(x, cos, sin):
    d = x.shape[-1]
    x1 = x[:, : d // 2]
    x2 = x[:, d // 2:]
    rot = jnp.concatenate([-x2, x1], axis=-1)
    return x * cos + rot * sin


def _flash_kernel(q_ref, k_ref, v_ref, cq_ref, sq_ref, ck_ref, sk_ref, st_ref, en_ref,
                  o_ref, m_scr, l_scr, acc_scr, *, scale, causal, tq, tk):
    j = pl.program_id(2)

    @pl.when(j == 0)
    def _init():
        m_scr[...] = jnp.full_like(m_scr, _NEG_INF)
        l_scr[...] = jnp.zeros_like(l_scr)
        acc_scr[...] = jnp.zeros_like(acc_scr)

    q = _rope(q_ref[0].astype(jnp.float32), cq_ref[...], sq_ref[...])
    k = _rope(k_ref[0].astype(jnp.float32), ck_ref[...], sk_ref[...])
    s = lax.dot_general(q.astype(jnp.bfloat16), k.astype(jnp.bfloat16),
                        (((1,), (1,)), ((), ())),
                        preferred_element_type=jnp.float32) * scale

    kpos = j * tk + lax.broadcasted_iota(jnp.int32, (tq, tk), 1)
    mask = (kpos >= st_ref[...]) & (kpos < en_ref[...])
    if causal:
        qpos = pl.program_id(1) * tq + lax.broadcasted_iota(jnp.int32, (tq, tk), 0)
        mask = mask & (qpos >= kpos)
    s = jnp.where(mask, s, _NEG_INF)

    m_prev = m_scr[...]
    m_new = jnp.maximum(m_prev, jnp.max(s, axis=-1, keepdims=True))
    alpha = jnp.exp(m_prev - m_new)
    p = jnp.exp(s - m_new)
    l_scr[...] = alpha * l_scr[...] + jnp.sum(p, axis=-1, keepdims=True)
    acc_scr[...] = alpha * acc_scr[...] + jnp.dot(
        p.astype(jnp.bfloat16), v_ref[0].astype(jnp.bfloat16),
        preferred_element_type=jnp.float32)
    m_scr[...] = m_new

    @pl.when(j == pl.num_programs(2) - 1)
    def _fin():
        o_ref[0] = (acc_scr[...] * pl.reciprocal(l_scr[...], approx=True)
                    ).astype(o_ref.dtype)


def flash_attention(q, k, v, cos, sin, start, end, scale, causal, block=256):
    """q: (H, S, Dh); k, v: (KV, S, Dh); cos/sin: (S, Dh); start/end: (S,) int32."""
    H, S, Dh = q.shape
    KV = k.shape[0]
    rep = H // KV
    blk, S_pad = _pick_tile(S, block, 128)
    pad = S_pad - S
    if pad:
        q = jnp.pad(q, ((0, 0), (0, pad), (0, 0)))
        k = jnp.pad(k, ((0, 0), (0, pad), (0, 0)))
        v = jnp.pad(v, ((0, 0), (0, pad), (0, 0)))
        cos = jnp.pad(cos, ((0, pad), (0, 0)), constant_values=1.0)
        sin = jnp.pad(sin, ((0, pad), (0, 0)))
        start = jnp.pad(start, (0, pad))
        end = jnp.pad(end, (0, pad))
    start2 = start.reshape(S_pad, 1).astype(jnp.int32)
    end2 = end.reshape(S_pad, 1).astype(jnp.int32)

    out = pl.pallas_call(
        functools.partial(_flash_kernel, scale=float(scale), causal=causal,
                          tq=blk, tk=blk),
        out_shape=jax.ShapeDtypeStruct((H, S_pad, Dh), jnp.float32),
        grid=(H, S_pad // blk, S_pad // blk),
        in_specs=[
            pl.BlockSpec((1, blk, Dh), lambda h, i, j: (h, i, 0)),
            pl.BlockSpec((1, blk, Dh), lambda h, i, j: (h // rep, j, 0)),
            pl.BlockSpec((1, blk, Dh), lambda h, i, j: (h // rep, j, 0)),
            pl.BlockSpec((blk, Dh), lambda h, i, j: (i, 0)),
            pl.BlockSpec((blk, Dh), lambda h, i, j: (i, 0)),
            pl.BlockSpec((blk, Dh), lambda h, i, j: (j, 0)),
            pl.BlockSpec((blk, Dh), lambda h, i, j: (j, 0)),
            pl.BlockSpec((blk, 1), lambda h, i, j: (i, 0)),
            pl.BlockSpec((blk, 1), lambda h, i, j: (i, 0)),
        ],
        out_specs=pl.BlockSpec((1, blk, Dh), lambda h, i, j: (h, i, 0)),
        scratch_shapes=[pltpu.VMEM((blk, 1), jnp.float32),
                        pltpu.VMEM((blk, 1), jnp.float32),
                        pltpu.VMEM((blk, Dh), jnp.float32)],
        compiler_params=pltpu.CompilerParams(
            dimension_semantics=("parallel", "parallel", "arbitrary")),
    )(q, k, v, cos, sin, cos, sin, start2, end2)
    return out[:, :S, :]


# ----------------------------------------------------------------------------
# Glue (window index, position ids, cu_seqlens) — mirrors the PyTorch reference
# ----------------------------------------------------------------------------
def _cu_to_start_end(cu, S):
    start = np.zeros(S, np.int32)
    end = np.zeros(S, np.int32)
    cu = np.asarray(cu, np.int64)
    for i in range(1, len(cu)):
        a, b = int(cu[i - 1]), int(cu[i])
        start[a:b] = a
        end[a:b] = b
    return jnp.asarray(start), jnp.asarray(end)


def get_window_index(grid_thw, vcfg):
    sms = vcfg["spatial_merge_size"]
    smu = sms * sms
    window_index = []
    cu_window_seqlens = [0]
    window_index_id = 0
    wsz = vcfg["window_size"] // sms // vcfg["patch_size"]
    for grid_t, grid_h, grid_w in np.asarray(grid_thw):
        llm_h, llm_w = grid_h // sms, grid_w // sms
        index = np.arange(grid_t * llm_h * llm_w).reshape(grid_t, llm_h, llm_w)
        pad_h = wsz - llm_h % wsz
        pad_w = wsz - llm_w % wsz
        nwh = (llm_h + pad_h) // wsz
        nww = (llm_w + pad_w) // wsz
        idx_p = np.pad(index, ((0, 0), (0, pad_h), (0, pad_w)), constant_values=-100)
        idx_p = idx_p.reshape(grid_t, nwh, wsz, nww, wsz)
        idx_p = idx_p.transpose(0, 1, 3, 2, 4).reshape(grid_t, nwh * nww, wsz, wsz)
        seqlens = (idx_p != -100).sum(axis=(2, 3)).reshape(-1)
        idx_p = idx_p.reshape(-1)
        idx_new = idx_p[idx_p != -100]
        window_index.append(idx_new + window_index_id)
        cu_tmp = np.cumsum(seqlens) * smu + cu_window_seqlens[-1]
        cu_window_seqlens.extend(cu_tmp.tolist())
        window_index_id += int(grid_t * llm_h * llm_w)
    return np.concatenate(window_index, axis=0), cu_window_seqlens


def mrope_cos_sin(position_ids, head_dim, mrope_section, theta):
    pos = np.asarray(position_ids, np.float32).T  # (3, S)
    inv_freq = 1.0 / (theta ** (np.arange(0, head_dim, 2, dtype=np.float32) / head_dim))
    freqs = pos[:, :, None] * inv_freq[None, None, :]  # (3, S, head_dim//2)
    cos3, sin3 = np.cos(freqs), np.sin(freqs)
    offs = np.concatenate([[0], np.cumsum(mrope_section)])
    cos_h = np.concatenate([cos3[i, :, offs[i]:offs[i + 1]] for i in range(3)], axis=-1)
    sin_h = np.concatenate([sin3[i, :, offs[i]:offs[i + 1]] for i in range(3)], axis=-1)
    cos = np.concatenate([cos_h, cos_h], axis=-1).astype(np.float32)
    sin = np.concatenate([sin_h, sin_h], axis=-1).astype(np.float32)
    return jnp.asarray(cos), jnp.asarray(sin)


# ----------------------------------------------------------------------------
# Model
# ----------------------------------------------------------------------------
def vision_block(bp, hidden, cos, sin, start, end, H, Dh, scale):
    S, D = hidden.shape
    n1 = rmsnorm(hidden, bp["norm1_w"])
    qkv = linear(n1, bp["qkv_w"], bp["qkv_b"])
    # TODO(synk): fold the (S,H,Dh)<->(H,S,Dh) transposes into BlockSpec index_maps
    # (needs a 128-multiple head_dim column layout in the qkv output).
    q = jnp.transpose(qkv[:, :D].reshape(S, H, Dh), (1, 0, 2))
    k = jnp.transpose(qkv[:, D:2 * D].reshape(S, H, Dh), (1, 0, 2))
    v = jnp.transpose(qkv[:, 2 * D:].reshape(S, H, Dh), (1, 0, 2))
    o = flash_attention(q, k, v, cos, sin, start, end, scale, causal=False)
    o = jnp.transpose(o, (1, 0, 2)).reshape(S, D)
    hidden = hidden + linear(o, bp["proj_w"], bp["proj_b"])
    n2 = rmsnorm(hidden, bp["norm2_w"])
    h = gate_up(n2, bp["gate_w"], bp["up_w"], bp["gate_b"], bp["up_b"])
    hidden = hidden + linear(h, bp["down_w"], bp["down_b"])
    return hidden


def vision_forward(vp, pixel_values, grid_thw, vcfg):
    sms = vcfg["spatial_merge_size"]
    smu = sms * sms
    D = vcfg["hidden_size"]
    H = vcfg["num_heads"]
    Dh = D // H

    patch_dim = (vcfg["in_channels"] * vcfg["temporal_patch_size"]
                 * vcfg["spatial_patch_size"] ** 2)
    x = pixel_values.reshape(-1, patch_dim)
    hidden = linear(x, vp["patch_embed_w"])  # Conv3d(stride==kernel) as matmul
    S = hidden.shape[0]

    # rotary position ids
    pos_ids = []
    for t, h, w in np.asarray(grid_thw):
        hpos = np.tile(np.arange(h)[:, None], (1, w))
        hpos = hpos.reshape(h // sms, sms, w // sms, sms).transpose(0, 2, 1, 3).reshape(-1)
        wpos = np.tile(np.arange(w)[None, :], (h, 1))
        wpos = wpos.reshape(h // sms, sms, w // sms, sms).transpose(0, 2, 1, 3).reshape(-1)
        pos_ids.append(np.tile(np.stack([hpos, wpos], axis=-1), (int(t), 1)))
    pos_ids = np.concatenate(pos_ids, axis=0)
    max_grid = int(np.max(np.asarray(grid_thw)[:, 1:]))
    dim = Dh // 2
    inv_freq = 1.0 / (10000.0 ** (np.arange(0, dim, 2, dtype=np.float32) / dim))
    rpe_full = np.outer(np.arange(max_grid, dtype=np.float32), inv_freq)
    rpe = rpe_full[pos_ids].reshape(S, -1)  # (S, Dh//2)

    window_index, cu_window_seqlens = get_window_index(grid_thw, vcfg)

    hidden = hidden.reshape(S // smu, smu, -1)[jnp.asarray(window_index)].reshape(S, -1)
    rpe = rpe.reshape(S // smu, smu, -1)[window_index].reshape(S, -1)
    cos = jnp.asarray(np.concatenate([np.cos(rpe), np.cos(rpe)], axis=-1).astype(np.float32))
    sin = jnp.asarray(np.concatenate([np.sin(rpe), np.sin(rpe)], axis=-1).astype(np.float32))

    cuw = np.asarray(cu_window_seqlens, np.int32)
    keep = np.concatenate([[True], cuw[1:] != cuw[:-1]])
    cuw = cuw[keep]
    g = np.asarray(grid_thw)
    cu_seqlens = np.repeat(g[:, 1] * g[:, 2], g[:, 0]).cumsum().astype(np.int32)
    cu_seqlens = np.concatenate([[0], cu_seqlens])

    full_start, full_end = _cu_to_start_end(cu_seqlens, S)
    win_start, win_end = _cu_to_start_end(cuw, S)

    scale = 1.0 / float(np.sqrt(Dh))
    for layer_num, bp in enumerate(vp["blocks"]):
        if layer_num in vcfg["fullatt_block_indexes"]:
            start, end = full_start, full_end
        else:
            start, end = win_start, win_end
        hidden = vision_block(bp, hidden, cos, sin, start, end, H, Dh, scale)

    # patch merger
    m = vp["merger"]
    ln = rmsnorm(hidden, m["ln_q_w"])
    h = ln.reshape(-1, D * smu)
    h = linear(h, m["fc1_w"], m["fc1_b"], act="gelu")
    h = linear(h, m["fc2_w"], m["fc2_b"])
    reverse = np.argsort(window_index)
    return h[jnp.asarray(reverse)]


def text_forward(tp, inputs_embeds, position_ids, cu_seqlen_prefill, tcfg):
    S, D = inputs_embeds.shape
    H = tcfg["num_heads"]
    KV = tcfg["num_kv_heads"]
    Dh = D // H
    cos, sin = mrope_cos_sin(position_ids, Dh, tcfg["mrope_section"], tcfg["rope_theta"])
    start, end = _cu_to_start_end(cu_seqlen_prefill, S)

    scale = 1.0 / float(np.sqrt(Dh))
    h = inputs_embeds
    for lp in tp["layers"]:
        n = rmsnorm(h, lp["ln1_w"])
        q = jnp.transpose(linear(n, lp["wq"], lp["bq"]).reshape(S, H, Dh), (1, 0, 2))
        k = jnp.transpose(linear(n, lp["wk"], lp["bk"]).reshape(S, KV, Dh), (1, 0, 2))
        v = jnp.transpose(linear(n, lp["wv"], lp["bv"]).reshape(S, KV, Dh), (1, 0, 2))
        # TODO(synk): paged KV-cache writeback (kv_cache/slots/hpu_attention_meta) has no
        # clean Pallas equivalent here; prefill-only attention is implemented.
        o = flash_attention(q, k, v, cos, sin, start, end, scale, causal=True)
        o = jnp.transpose(o, (1, 0, 2)).reshape(S, D)
        h = h + linear(o, lp["wo"])
        n2 = rmsnorm(h, lp["ln2_w"])
        hmlp = gate_up(n2, lp["wg"], lp["wu"])
        h = h + linear(hmlp, lp["wd"])
    return rmsnorm(h, tp["final_norm_w"])


class Qwen25VLPallas:
    def __init__(self, params, cfg):
        self.params = params
        self.cfg = cfg

    # ---- Qwen2_5VLForConditionalGeneration.get_position_ids ----
    def get_position_ids(self, input_ids, image_grid_thw=None):
        input_ids = np.asarray(input_ids)
        if image_grid_thw is None:
            return jnp.asarray(np.tile(np.arange(input_ids.shape[0])[:, None], (1, 3)))
        sms = self.cfg["vision"]["spatial_merge_size"]
        n = input_ids.shape[0]
        g = np.asarray(image_grid_thw)
        vision_starts = np.where(input_ids == self.cfg["vision_start_token_id"])[0]
        vision_ends = np.where(input_ids == self.cfg["vision_end_token_id"])[0]
        prev_end = np.concatenate([[0], vision_ends[:-1]])
        text_lens = vision_starts - prev_end + 1
        widths_max = np.concatenate([[0], g[:-1, 2] // sms])
        seg_lens = np.cumsum(widths_max + text_lens)
        text_seg_lens = seg_lens - text_lens
        full = []
        for i in range(len(vision_starts)):
            t = int(g[i][0])
            h = int(g[i][1]) // sms
            w = int(g[i][2]) // sms
            t_idx = np.repeat(np.arange(t), h * w)
            h_idx = np.tile(np.repeat(np.arange(h), w), t)
            w_idx = np.tile(np.arange(w), t * h)
            im = np.stack([t_idx, h_idx, w_idx], axis=0) + seg_lens[i]
            txt = np.tile(np.arange(text_lens[i])[None, :], (3, 1)) + text_seg_lens[i]
            full.append(txt)
            full.append(im)
        max_s = full[-1].max() + 1
        final_text_len = n - vision_ends[-1]
        if final_text_len > 0:
            full.append(np.tile(np.arange(final_text_len)[None, :], (3, 1)) + max_s)
        position_ids = np.concatenate(full, axis=1).reshape(3, -1).T
        return jnp.asarray(position_ids)

    def get_vision_embeds(self, pixel_values, image_grid_thw=None):
        return vision_forward(self.params["vision"], pixel_values, image_grid_thw,
                              self.cfg["vision"])

    def get_inputs_embeds(self, input_ids, vision_embeds=None):
        embeds = jnp.take(self.params["text"]["embed"], input_ids, axis=0)
        if vision_embeds is not None:
            mask = input_ids == self.cfg["image_token_id"]
            idx = jnp.clip(jnp.cumsum(mask) - 1, 0, vision_embeds.shape[0] - 1)
            embeds = jnp.where(mask[:, None], vision_embeds[idx], embeds)
        return embeds

    def forward(self, inputs_embeds, position_ids, cu_seqlen_prefill, kv_cache,
                slots, seqlen, hpu_attention_meta, lm_head_indices,
                attention_mask=None, adapter_data=None, image_indices=None):
        hidden = text_forward(self.params["text"], inputs_embeds, position_ids,
                              cu_seqlen_prefill, self.cfg["text"])
        if lm_head_indices is not None:
            hidden = hidden[lm_head_indices]
        logits = linear(hidden, self.params["text"]["lm_head_w"])
        return logits, None  # (logits, speculative_logits)


# ----------------------------------------------------------------------------
# Deterministic parameter init (weights stored pre-transposed (K, N) in bf16)
# ----------------------------------------------------------------------------
def init_params(key, cfg):
    v = cfg["vision"]
    t = cfg["text"]
    D = v["hidden_size"]
    I = v["intermediate_size"]
    patch_dim = v["in_channels"] * v["temporal_patch_size"] * v["spatial_patch_size"] ** 2
    merged = D * v["spatial_merge_size"] ** 2
    TD = t["hidden_size"]
    TI = t["intermediate_size"]
    TH = t["num_heads"]
    TKV = t["num_kv_heads"]
    Dh = TD // TH

    kit = iter(jax.random.split(key, 256))

    def w(shape, scale=0.02):
        return jax.random.normal(next(kit), shape, jnp.float32) * scale

    def wT(k_dim, n_dim):  # pre-transposed (K, N), bf16 -- "transposed once at load"
        return w((k_dim, n_dim)).astype(jnp.bfloat16)

    vision = {
        "patch_embed_w": wT(patch_dim, D),  # Conv3d (D,C,T,P,P) flattened + transposed
        "blocks": [],
        "merger": {
            "ln_q_w": jnp.ones((D,), jnp.float32),
            "fc1_w": wT(merged, merged), "fc1_b": w((merged,)),
            "fc2_w": wT(merged, TD), "fc2_b": w((TD,)),
        },
    }
    for _ in range(v["depth"]):
        vision["blocks"].append({
            "norm1_w": jnp.ones((D,), jnp.float32),
            "qkv_w": wT(D, 3 * D), "qkv_b": w((3 * D,)),
            "proj_w": wT(D, D), "proj_b": w((D,)),
            "norm2_w": jnp.ones((D,), jnp.float32),
            "gate_w": wT(D, I), "gate_b": w((I,)),
            "up_w": wT(D, I), "up_b": w((I,)),
            "down_w": wT(I, D), "down_b": w((D,)),
        })

    text = {
        "embed": w((t["vocab_size"], TD)),
        "layers": [],
        "final_norm_w": jnp.ones((TD,), jnp.float32),
        "lm_head_w": wT(TD, t["vocab_size"]),
    }
    for _ in range(t["num_layers"]):
        text["layers"].append({
            "ln1_w": jnp.ones((TD,), jnp.float32),
            "wq": wT(TD, TH * Dh), "bq": w((TH * Dh,)),
            "wk": wT(TD, TKV * Dh), "bk": w((TKV * Dh,)),
            "wv": wT(TD, TKV * Dh), "bv": w((TKV * Dh,)),
            "wo": wT(TH * Dh, TD),
            "ln2_w": jnp.ones((TD,), jnp.float32),
            "wg": wT(TD, TI), "wu": wT(TD, TI), "wd": wT(TI, TD),
        })
    return {"vision": vision, "text": text}


# ----------------------------------------------------------------------------
# Main
# ----------------------------------------------------------------------------
if __name__ == "__main__":
    CFG = {
        "vision_start_token_id": 3,
        "vision_end_token_id": 4,
        "image_token_id": 2,
        "vocab_size": 256,
        "vision": {
            "in_channels": 3, "temporal_patch_size": 2, "patch_size": 2,
            "spatial_patch_size": 2, "hidden_size": 256, "num_heads": 2,
            "intermediate_size": 512, "depth": 2, "spatial_merge_size": 2,
            "window_size": 8, "fullatt_block_indexes": [0],
        },
        "text": {
            "hidden_size": 256, "num_heads": 2, "num_kv_heads": 1,
            "intermediate_size": 512, "num_layers": 2, "vocab_size": 256,
            "rope_theta": 10000.0, "mrope_section": [32, 16, 16],
        },
    }

    key = jax.random.PRNGKey(0)
    kparams, kpix = jax.random.split(key)
    params = init_params(kparams, CFG)
    model = Qwen25VLPallas(params, CFG)

    # one image: grid_thw = (t=1, h=8, w=8) -> 64 patches -> 16 merged vision tokens
    grid_thw = np.array([[1, 8, 8]], np.int64)
    num_patches = int(np.prod(grid_thw[0]))
    patch_dim = 3 * 2 * 2 * 2  # C * T * P * P
    pixel_values = jax.random.normal(kpix, (num_patches, patch_dim), jnp.float32)

    IMG = CFG["image_token_id"]
    START = CFG["vision_start_token_id"]
    END = CFG["vision_end_token_id"]
    n_img_tokens = num_patches // (CFG["vision"]["spatial_merge_size"] ** 2)
    input_ids_np = np.array([5, 6, START] + [IMG] * n_img_tokens + [END, 7, 8, 9], np.int32)
    input_ids = jnp.asarray(input_ids_np)

    vision_embeds = model.get_vision_embeds(pixel_values, image_grid_thw=grid_thw)
    inputs_embeds = model.get_inputs_embeds(input_ids, vision_embeds)
    position_ids = model.get_position_ids(input_ids_np, image_grid_thw=grid_thw)

    cu_seqlen_prefill = np.array([0, input_ids_np.shape[0]], np.int32)
    lm_head_indices = jnp.array([input_ids_np.shape[0] - 1], jnp.int32)

    logits, speculative_logits = model.forward(
        inputs_embeds=inputs_embeds,
        position_ids=position_ids,
        cu_seqlen_prefill=cu_seqlen_prefill,
        kv_cache=None, slots=None, seqlen=None, hpu_attention_meta=None,
        lm_head_indices=lm_head_indices)

    logits = jax.block_until_ready(logits)
    assert logits.shape == (1, CFG["vocab_size"])
    assert speculative_logits is None
    assert bool(jnp.all(jnp.isfinite(logits)))
    print("KERNEL_OK")
</pallas_src>

<mosaic_0001>
module attributes {stable_mosaic.version = 11 : i64} {
  func.func @_linear_kernel(%arg0: i32, %arg1: i32, %arg2: i32, %arg3: memref<64x128xf32, #tpu.memory_space<vmem>>, %arg4: memref<128x256xbf16, #tpu.memory_space<vmem>>, %arg5: memref<64x256xf32, #tpu.memory_space<vmem>>, %arg6: memref<64x256xf32, #tpu.memory_space<vmem>>) attributes {dimension_semantics = [#tpu.dimension_semantics<parallel>, #tpu.dimension_semantics<parallel>, #tpu.dimension_semantics<arbitrary>], iteration_bounds = array<i64: 1, 1, 1>, scalar_prefetch = 0 : i64, scratch_operands = 1 : i64, tpu.core_type = #tpu.core_type<tc>, window_params = [{transform_indices = @transform_0, window_bounds = array<i64: 64, 128>}, {transform_indices = @transform_1, window_bounds = array<i64: 128, 256>}, {transform_indices = @transform_2, window_bounds = array<i64: 64, 256>}]} {
    %c0_i32 = arith.constant 0 : i32
    %0 = arith.cmpi eq, %arg2, %c0_i32 : i32
    %1 = arith.extui %0 : i1 to i32
    %c0_i32_0 = arith.constant 0 : i32
    %2 = arith.cmpi ne, %1, %c0_i32_0 : i32
    scf.if %2 {
      %cst_10 = arith.constant 0.000000e+00 : f32
      %13 = vector.broadcast %cst_10 : f32 to vector<64x256xf32>
      %c0_11 = arith.constant 0 : index
      %c0_12 = arith.constant 0 : index
      %14 = vector.load %arg6[%c0_11, %c0_12] : memref<64x256xf32, #tpu.memory_space<vmem>>, vector<64x256xf32>
      tpu.vector_store %arg6[%c0_11, %c0_12], %13 {strides = array<i32>} : memref<64x256xf32, #tpu.memory_space<vmem>>, vector<64x256xf32>,
    } else {
    }
    %c0 = arith.constant 0 : index
    %c0_1 = arith.constant 0 : index
    %3 = vector.load %arg6[%c0, %c0_1] : memref<64x256xf32, #tpu.memory_space<vmem>>, vector<64x256xf32>
    %c0_2 = arith.constant 0 : index
    %c0_3 = arith.constant 0 : index
    %4 = vector.load %arg3[%c0_2, %c0_3] : memref<64x128xf32, #tpu.memory_space<vmem>>, vector<64x128xf32>
    %5 = arith.truncf %4 : vector<64x128xf32> to vector<64x128xbf16>
    %c0_4 = arith.constant 0 : index
    %c0_5 = arith.constant 0 : index
    %6 = vector.load %arg4[%c0_4, %c0_5] : memref<128x256xbf16, #tpu.memory_space<vmem>>, vector<128x256xbf16>
    %cst = arith.constant dense<0.000000e+00> : vector<64x256xf32>
    %7 = tpu.matmul %5, %6, %cst {dimension_numbers = #tpu.dot_dimension_numbers<[1], [0], [0], [1], [0, 0, 1, 1], [], []>} : vector<64x128xbf16>, vector<128x256xbf16>, vector<64x256xf32> -> vector<64x256xf32>
    %8 = arith.addf %3, %7 : vector<64x256xf32>
    %c0_6 = arith.constant 0 : index
    %c0_7 = arith.constant 0 : index
    %9 = vector.load %arg6[%c0_6, %c0_7] : memref<64x256xf32, #tpu.memory_space<vmem>>, vector<64x256xf32>
    tpu.vector_store %arg6[%c0_6, %c0_7], %8 {strides = array<i32>} : memref<64x256xf32, #tpu.memory_space<vmem>>, vector<64x256xf32>,
    %c0_i32_8 = arith.constant 0 : i32
    %10 = arith.cmpi eq, %arg2, %c0_i32_8 : i32
    %11 = arith.extui %10 : i1 to i32
    %c0_i32_9 = arith.constant 0 : i32
    %12 = arith.cmpi ne, %11, %c0_i32_9 : i32
    scf.if %12 {
      %c0_10 = arith.constant 0 : index
      %c0_11 = arith.constant 0 : index
      %13 = vector.load %arg6[%c0_10, %c0_11] : memref<64x256xf32, #tpu.memory_space<vmem>>, vector<64x256xf32>
      %c0_12 = arith.constant 0 : index
      %c0_13 = arith.constant 0 : index
      %14 = vector.load %arg5[%c0_12, %c0_13] : memref<64x256xf32, #tpu.memory_space<vmem>>, vector<64x256xf32>
      tpu.vector_store %arg5[%c0_12, %c0_13], %13 {strides = array<i32>} : memref<64x256xf32, #tpu.memory_space<vmem>>, vector<64x256xf32>,
    } else {
    }
    return
  }
  func.func @transform_0(%arg0: i32, %arg1: i32, %arg2: i32) -> (i32, i32) {
    %c0_i32 = arith.constant 0 : i32
    return %arg0, %arg2 : i32, i32
  }
  func.func @transform_1(%arg0: i32, %arg1: i32, %arg2: i32) -> (i32, i32) {
    %c0_i32 = arith.constant 0 : i32
    return %arg2, %arg1 : i32, i32
  }
  func.func @transform_2(%arg0: i32, %arg1: i32, %arg2: i32) -> (i32, i32) {
    %c0_i32 = arith.constant 0 : i32
    return %arg0, %arg1 : i32, i32
  }
}

</mosaic_0001>

<bundles_post_ra>
// kernel: tpu_custom_call.1
= control target key start
LH: loop header
LB: loop body
LE: loop exit
PB: predicated region body
PF: predicated region fallthrough
CT: control target
= control target key end

     0   :  { %7 = vsyncpa [#allocation4], 0  ;;  %s545_s0 = inlined_call_operand.hbm [shape: f32[64,128], index: 0, kind: input, shape index: {}]   ;;  %s546_s1 = inlined_call_operand.hbm [shape: bf16[128,256], index: 1, kind: input, shape index: {}]   ;;  %s547_s2 = inlined_call_operand.hbm [shape: f32[64,256], index: 2, kind: output, shape index: {}]  }
   0x1   :  { %8 = vsyncpa [#allocation7], 0 }
   0x2   :  { %9 = vsyncpa [#allocation5], 0  ;;  %s14_s11 = sshll.u32 %s545_s0, 4  ;;  %s514_s12 = smov [#allocation3]   ;;  %s15_s11 = int_to_ptr.hbm [resolvable:$true] %s14_s11 }
   0x3   :  { %s16_s13 = sshll.u32 %s514_s12, 4  ;;  %s27_s16 = sshll.u32 %s546_s1, 4  ;;  %s17_s13 = int_to_ptr.vmem [resolvable:$true] %s16_s13  ;;  %s28_s16 = int_to_ptr.hbm [resolvable:$true] %s27_s16 }
   0x4   :  { %s515_s17 = smov 128   ;;  %s516_s18 = smov 8  }
   0x5   :  { %22 = dma.hbm_to_vmem [thread:$0]  %s15_s11, 1024, %s17_s13, [#allocation4], %s515_s17, %s515_s17, %s516_s18  }
   0x6   :  { %s517_s19 = smov [#allocation6]  }
   0x7   :  { %s29_s20 = sshll.u32 %s517_s19, 4  ;;  %s30_s20 = int_to_ptr.vmem [resolvable:$true] %s29_s20 }
   0x8   :  { %35 = dma.hbm_to_vmem [thread:$0]  %s28_s16, 2048, %s30_s20, [#allocation7], %s515_s17, %s515_s17, %s516_s18  }
   0x9   :  { %508 = dma.done.wait [#allocation4], 1024  }
   0xa   :  { %509 = vsyncadd [#allocation4], 4294966272 }
   0xb   :  { %510 = dma.done.wait [#allocation7], 2048  }
   0xc   :  { %511 = vsyncadd [#allocation7], 4294965248  ;;  %v391_v0 = vld [vmem:[#allocation6 + $0x70] sm:$0xf]  ;;  %v412_v1 = vld [vmem:[#allocation6 + $0x74] sm:$0xf0] }
   0xd   :  { %v411_v2 = vld [vmem:[#allocation6 + $0x74] sm:$0xf]  ;;  %v392_v3 = vor.u32 %v412_v1, %v391_v0  ;;  %v393_v4 = vld [vmem:[#allocation6 + $0x78] sm:$0xf0]  ;;  %v383_v5 = vld [vmem:[#allocation6 + $0x60] sm:$0xf] }
   0xe   :  { %v410_v6 = vld [vmem:[#allocation6 + $0x64] sm:$0xf0]  ;;  %v396_v7 = vor.u32 %v411_v2, %v393_v4  ;;  %v409_v8 = vld [vmem:[#allocation6 + $0x64] sm:$0xf]  ;;  %v385_v9 = vld [vmem:[#allocation6 + $0x68] sm:$0xf0] }
   0xf   :  { %188 = vmatpush.bf16.msra.mxu0 %v392_v3  ;;  %413 = vmatpush.bf16.msra.mxu2 %v392_v3  ;;  %v384_v10 = vor.u32 %v410_v6, %v383_v5  ;;  %v388_v11 = vor.u32 %v409_v8, %v385_v9  ;;  %v375_v12 = vld [vmem:[#allocation6 + $0x50] sm:$0xf]  ;;  %v408_v13 = vld [vmem:[#allocation6 + $0x54] sm:$0xf0]  ;;  %v407_v14 = vld [vmem:[#allocation6 + $0x54] sm:$0xf] }
  0x10   :  { %217 = vmatpush.bf16.msra.mxu1 %v396_v7  ;;  %421 = vmatpush.bf16.msra.mxu3 %v396_v7  ;;  %v377_v15 = vld [vmem:[#allocation6 + $0x58] sm:$0xf0]  ;;  %v376_v16 = vor.u32 %v408_v13, %v375_v12  ;;  %v367_v18 = vld [vmem:[#allocation6 + $0x40] sm:$0xf]  ;;  %v406_v19 = vld [vmem:[#allocation6 + $0x44] sm:$0xf0] }
  0x11   :  { %v380_v17 = vor.u32 %v407_v14, %v377_v15  ;;  %v405_v20 = vld [vmem:[#allocation6 + $0x44] sm:$0xf]  ;;  %v369_v21 = vld [vmem:[#allocation6 + $0x48] sm:$0xf0]  ;;  %v368_v22 = vor.u32 %v406_v19, %v367_v18  ;;  %v359_v24 = vld [vmem:[#allocation6 + $0x30] sm:$0xf] }
  0x12   :  { %v372_v23 = vor.u32 %v405_v20, %v369_v21  ;;  %v404_v25 = vld [vmem:[#allocation6 + $0x34] sm:$0xf0]  ;;  %v403_v26 = vld [vmem:[#allocation6 + $0x34] sm:$0xf]  ;;  %v361_v27 = vld [vmem:[#allocation6 + $0x38] sm:$0xf0] }
  0x13   :  { %189 = vmatpush.bf16.msra.mxu0 %v384_v10  ;;  %414 = vmatpush.bf16.msra.mxu2 %v384_v10  ;;  %v360_v28 = vor.u32 %v404_v25, %v359_v24  ;;  %v364_v29 = vor.u32 %v403_v26, %v361_v27  ;;  %v351_v30 = vld [vmem:[#allocation6 + $0x20] sm:$0xf]  ;;  %v402_v31 = vld [vmem:[#allocation6 + $0x24] sm:$0xf0]  ;;  %v401_v32 = vld [vmem:[#allocation6 + $0x24] sm:$0xf] }
  0x14   :  { %218 = vmatpush.bf16.msra.mxu1 %v388_v11  ;;  %422 = vmatpush.bf16.msra.mxu3 %v388_v11  ;;  %v353_v33 = vld [vmem:[#allocation6 + $0x28] sm:$0xf0]  ;;  %v352_v34 = vor.u32 %v402_v31, %v351_v30  ;;  %v343_v36 = vld [vmem:[#allocation6 + $0x10] sm:$0xf]  ;;  %v400_v37 = vld [vmem:[#allocation6 + $0x14] sm:$0xf0] }
  0x15   :  { %v356_v35 = vor.u32 %v401_v32, %v353_v33  ;;  %v399_v38 = vld [vmem:[#allocation6 + $0x14] sm:$0xf]  ;;  %v345_v39 = vld [vmem:[#allocation6 + $0x18] sm:$0xf0]  ;;  %v344_v40 = vor.u32 %v400_v37, %v343_v36  ;;  %v335_v42 = vld [vmem:[#allocation6] sm:$0xf] }
  0x16   :  { %v348_v41 = vor.u32 %v399_v38, %v345_v39  ;;  %v398_v43 = vld [vmem:[#allocation6 + $0x4] sm:$0xf0]  ;;  %v397_v44 = vld [vmem:[#allocation6 + $0x4] sm:$0xf]  ;;  %v337_v45 = vld [vmem:[#allocation6 + $0x8] sm:$0xf0] }
  0x17   :  { %190 = vmatpush.bf16.msra.mxu0 %v376_v16  ;;  %415 = vmatpush.bf16.msra.mxu2 %v376_v16  ;;  %v80_v46 = vld [vmem:[#allocation3] sm:$0xff]  ;;  %v336_v47 = vor.u32 %v398_v43, %v335_v42  ;;  %v81_v48 = vld [vmem:[#allocation3 + $0x8] sm:$0xff]  ;;  %v340_v51 = vor.u32 %v397_v44, %v337_v45  ;;  %v82_v54 = vld [vmem:[#allocation3 + $0x10] sm:$0xff]  ;;  %s518_s0 = smov [#allocation8]   ;;  %s319_s23 = sshll.u32 %s547_s2, 4  ;;  %s320_s23 = int_to_ptr.hbm [resolvable:$true] %s319_s23 }
  0x18   :  { %219 = vmatpush.bf16.msra.mxu1 %v380_v17  ;;  %423 = vmatpush.bf16.msra.mxu3 %v380_v17  ;;  %v84_v49 = vld [vmem:[#allocation3 + $0x20] sm:$0xff]  ;;  %v85_v50 = vld [vmem:[#allocation3 + $0x28] sm:$0xff]  ;;  %v88_v52 = vpack.c.bf16 %v81_v48, %v80_v46  ;;  %v83_v55 = vld [vmem:[#allocation3 + $0x18] sm:$0xff]  ;;  %s317_s1 = sshll.u32 %s518_s0, 4  ;;  %s519_s24 = smov 256   ;;  %s318_s1 = int_to_ptr.vmem [resolvable:$true] %s317_s1 }
  0x19   :  { %v90_v53 = vpack.c.bf16 %v85_v50, %v84_v49  ;;  %v86_v56 = vld [vmem:[#allocation3 + $0x30] sm:$0xff]  ;;  %v87_v57 = vld [vmem:[#allocation3 + $0x38] sm:$0xff]  ;;  %v89_v58 = vpack.c.bf16 %v83_v55, %v82_v54  ;;  %s520_s25 = smov 16  }
  0x1a   :  { %v91_v59 = vpack.c.bf16 %v87_v57, %v86_v56 }
  0x1b   :  { %191 = vmatpush.bf16.msra.mxu0 %v368_v22  ;;  %416 = vmatpush.bf16.msra.mxu2 %v368_v22 }
  0x1c   :  { %220 = vmatpush.bf16.msra.mxu1 %v372_v23  ;;  %424 = vmatpush.bf16.msra.mxu3 %v372_v23 }
  0x1f   :  { %192 = vmatpush.bf16.msra.mxu0 %v360_v28  ;;  %417 = vmatpush.bf16.msra.mxu2 %v360_v28 }
  0x20   :  { %221 = vmatpush.bf16.msra.mxu1 %v364_v29  ;;  %425 = vmatpush.bf16.msra.mxu3 %v364_v29 }
  0x23   :  { %193 = vmatpush.bf16.msra.mxu0 %v352_v34  ;;  %418 = vmatpush.bf16.msra.mxu2 %v352_v34 }
  0x24   :  { %222 = vmatpush.bf16.msra.mxu1 %v356_v35  ;;  %426 = vmatpush.bf16.msra.mxu3 %v356_v35 }
  0x27   :  { %194 = vmatpush.bf16.msra.mxu0 %v344_v40  ;;  %419 = vmatpush.bf16.msra.mxu2 %v344_v40 }
  0x28   :  { %223 = vmatpush.bf16.msra.mxu1 %v348_v41  ;;  %427 = vmatpush.bf16.msra.mxu3 %v348_v41 }
  0x2b   :  { %195 = vmatpush.bf16.msra.mxu0 %v336_v47  ;;  %420 = vmatpush.bf16.msra.mxu2 %v336_v47 }
  0x2c   :  { %224 = vmatpush.bf16.msra.mxu1 %v340_v51  ;;  %428 = vmatpush.bf16.msra.mxu3 %v340_v51 }
  0x2e   :  { %196 = vmatmul.bf16.vlgmr.msra.gmra.mxu0 %v88_v52  ;;  %206 = vmatmul.bf16.vlgmr.msra.gmra.mxu2 %v90_v53 }
  0x2f   :  { %225 = vmatmul.bf16.vlgmr.msra.gmra.mxu1 %v88_v52  ;;  %235 = vmatmul.bf16.vlgmr.msra.gmra.mxu3 %v90_v53 }
  0x3e   :  { %201 = vmatmul.bf16.gmra.mxu0 %v89_v58  ;;  %211 = vmatmul.bf16.gmra.mxu2 %v91_v59 }
  0x3f   :  { %230 = vmatmul.bf16.gmra.mxu1 %v89_v58  ;;  %240 = vmatmul.bf16.gmra.mxu3 %v91_v59 }
  0xab   :  { %v197_v60 = vpop.f32.mrf.mxu0 }
  0xac   :  { %297 = vst [vmem:[#allocation8] sm:$0xff] %v197_v60  ;;  %v226_v61 = vpop.f32.mrf.mxu1 }
  0xad   :  { %298 = vst [vmem:[#allocation8 + $0x8] sm:$0xff] %v226_v61 }
  0xb1   :  { %v207_v62 = vpop.f32.mrf.mxu2 }
  0xb2   :  { %305 = vst [vmem:[#allocation8 + $0x40] sm:$0xff] %v207_v62  ;;  %v236_v63 = vpop.f32.mrf.mxu3 }
  0xb3   :  { %306 = vst [vmem:[#allocation8 + $0x48] sm:$0xff] %v236_v63  ;;  %v199_v0 = vpop.f32.mrf.mxu0 }
  0xb4   :  { %299 = vst [vmem:[#allocation8 + $0x10] sm:$0xff] %v199_v0  ;;  %v228_v1 = vpop.f32.mrf.mxu1 }
  0xb5   :  { %300 = vst [vmem:[#allocation8 + $0x18] sm:$0xff] %v228_v1 }
  0xb9   :  { %v209_v2 = vpop.f32.mrf.mxu2 }
  0xba   :  { %307 = vst [vmem:[#allocation8 + $0x50] sm:$0xff] %v209_v2  ;;  %v238_v3 = vpop.f32.mrf.mxu3 }
  0xbb   :  { %308 = vst [vmem:[#allocation8 + $0x58] sm:$0xff] %v238_v3  ;;  %v202_v4 = vpop.f32.mrf.mxu0 }
  0xbc   :  { %301 = vst [vmem:[#allocation8 + $0x20] sm:$0xff] %v202_v4  ;;  %v231_v5 = vpop.f32.mrf.mxu1 }
  0xbd   :  { %302 = vst [vmem:[#allocation8 + $0x28] sm:$0xff] %v231_v5 }
  0xc1   :  { %v212_v6 = vpop.f32.mrf.mxu2 }
  0xc2   :  { %309 = vst [vmem:[#allocation8 + $0x60] sm:$0xff] %v212_v6  ;;  %v241_v7 = vpop.f32.mrf.mxu3 }
  0xc3   :  { %310 = vst [vmem:[#allocation8 + $0x68] sm:$0xff] %v241_v7  ;;  %v204_v8 = vpop.f32.mrf.mxu0 }
  0xc4   :  { %303 = vst [vmem:[#allocation8 + $0x30] sm:$0xff] %v204_v8  ;;  %v233_v9 = vpop.f32.mrf.mxu1 }
  0xc5   :  { %304 = vst [vmem:[#allocation8 + $0x38] sm:$0xff] %v233_v9 }
  0xc9   :  { %v214_v10 = vpop.f32.mrf.mxu2 }
  0xca   :  { %311 = vst [vmem:[#allocation8 + $0x70] sm:$0xff] %v214_v10  ;;  %v243_v11 = vpop.f32.mrf.mxu3 }
  0xcb   :  { %312 = vst [vmem:[#allocation8 + $0x78] sm:$0xff] %v243_v11 }
  0xcc   :  { %325 = dma.vmem_to_hbm [thread:$0]  %s318_s1, 2048, %s320_s23, [#allocation5], %s519_s24, %s519_s24, %s520_s25  }
  0xcd   :  { %512 = dma.done.wait [#allocation5], 2048  }
  0xce   :  { %513 = vsyncadd [#allocation5], 4294965248 }
  0xcf   :  { %330 = vsyncpa [#allocation4], 1 }
  0xd0   :  { %331 = vsyncpa [#allocation7], 1 }
  0xd1   :  { %332 = vsyncpa [#allocation5], 1 }

</bundles_post_ra>
